<compile_context>
chip_gen: v7x
topology: tpu7x:2x2x1
jax: 0.10.0
libtpu: 0.0.40
codegen_flags: <defaults>
</compile_context>

<pallas_src>
import functools

import jax
import jax.numpy as jnp
from jax.experimental import pallas as pl
from jax.experimental.pallas import tpu as pltpu


_LANE = 128  # vreg lane width: lane-multiple hidden dims -> MXU-aligned matmuls


def _round_up(n, m):
    return (n + m - 1) // m * m


def _cdiv(a, b):
    return (a + b - 1) // b


# ---------------------------------------------------------------------------
# Kernel
# ---------------------------------------------------------------------------
def decoder_kernel(x_ref, w0_ref, b0_ref, w1_ref, b1_ref, w2_ref, b2_ref, o_ref):
    """Fused 3-layer MLP for one batch tile: relu(relu(relu(x@W0+b0)@W1+b1)@W2+b2).

    Matmul operands use the weights' dtype (bf16 recommended on v5e/v6e/v7x);
    accumulation, bias add and ReLU stay in f32.
    """
    mm = w0_ref.dtype
    x = x_ref[...].astype(mm)
    # layer 0: Linear(dim_z -> dim_h) + ReLU
    h = jnp.dot(x, w0_ref[...], preferred_element_type=jnp.float32) + b0_ref[...]
    h = jnp.maximum(h, 0.0)
    # layer 1: Linear(dim_h -> 2*dim_h) + ReLU
    h = jnp.dot(h.astype(mm), w1_ref[...], preferred_element_type=jnp.float32) + b1_ref[...]
    h = jnp.maximum(h, 0.0)
    # layer 2: Linear(2*dim_h -> dim_input) + ReLU
    h = jnp.dot(h.astype(mm), w2_ref[...], preferred_element_type=jnp.float32) + b2_ref[...]
    h = jnp.maximum(h, 0.0)
    o_ref[...] = h.astype(o_ref.dtype)


# ---------------------------------------------------------------------------
# One-time parameter preparation (hoisted out of the per-call path)
# ---------------------------------------------------------------------------
def prepare_decoder_params(params, compute_dtype=jnp.bfloat16):
    """Pad the *hidden* feature dims to 128-lane multiples and cast weights to the
    MXU operand dtype.  Call ONCE (at init) and reuse the result so the padding /
    cast HBM traffic isn't paid on every forward call.

    Padding is semantics-preserving: padded hidden columns have zero weight and
    zero bias -> relu(0) = 0, and the matching padded rows of the next weight are
    zero, so they contribute nothing downstream.  dim_z / dim_input stay unpadded
    (they're streamed from/to HBM every call).  Biases stay f32.
    """
    w0, b0, w1, b1, w2, b2 = params
    dz, dh = w0.shape
    dh2 = w1.shape[1]
    dout = w2.shape[1]
    dh_p, dh2_p = _round_up(dh, _LANE), _round_up(dh2, _LANE)
    mm = jnp.dtype(compute_dtype) if compute_dtype is not None else jnp.dtype(w0.dtype)

    def pad(a, rows, cols, dtype):
        a = jnp.asarray(a)
        a = jnp.pad(a, ((0, rows - a.shape[0]), (0, cols - a.shape[1])))
        return a.astype(dtype)

    w0p = pad(w0, dz, dh_p, mm)
    b0p = pad(jnp.asarray(b0).reshape(1, -1), 1, dh_p, jnp.float32)
    w1p = pad(w1, dh_p, dh2_p, mm)
    b1p = pad(jnp.asarray(b1).reshape(1, -1), 1, dh2_p, jnp.float32)
    w2p = pad(w2, dh2_p, dout, mm)
    b2p = pad(jnp.asarray(b2).reshape(1, -1), 1, dout, jnp.float32)
    return (w0p, b0p, w1p, b1p, w2p, b2p)


# ---------------------------------------------------------------------------
# Capability / hardware queries
# ---------------------------------------------------------------------------
@functools.lru_cache(maxsize=None)
def _single_buffer_weights_supported():
    """Explicit feature probe for pipeline_mode=pl.Buffered(1) (single-buffered
    grid-invariant blocks).  A tiny dedicated probe kernel keeps the real decoder
    pallas_call free of blanket try/except that could mask genuine lowering errors.
    """
    if not hasattr(pl, "Buffered"):
        return False

    def _probe_kernel(x_ref, o_ref):
        o_ref[...] = x_ref[...] + 1.0

    try:
        fn = pl.pallas_call(
            _probe_kernel,
            out_shape=jax.ShapeDtypeStruct((16, 128), jnp.float32),
            grid=(2,),
            in_specs=[pl.BlockSpec((8, 128), lambda i: (0, 0),
                                   pipeline_mode=pl.Buffered(1))],
            out_specs=pl.BlockSpec((8, 128), lambda i: (i, 0)),
        )
        jax.block_until_ready(fn(jnp.zeros((8, 128), jnp.float32)))
        return True
    except Exception:  # probe only; the real decoder kernel never runs under this except
        return False


def _vmem_budget_bytes():
    """Generation-aware VMEM budget: ~85% of physical VMEM per TensorCore
    (~108 MiB on v5e/v6e's 128 MiB, ~54 MiB on v7x's 64 MiB)."""
    try:
        cap = int(pltpu.get_tpu_info().vmem_capacity_bytes)
    except Exception:  # hardware-info query only; fall back to v7x-sized (most restrictive)
        cap = 64 << 20
    return min(int(cap * 0.85), cap - (8 << 20)), cap


# ---------------------------------------------------------------------------
# Forward wrapper
# ---------------------------------------------------------------------------
def decoder_forward(x, params, *, batch_tile=2048, compute_dtype=jnp.bfloat16,
                    params_prepared=False):
    """Fused Decoder MLP forward pass.  x: (B, dim_z) -> (B, dim_input).

    For repeated calls, run `prepare_decoder_params` once and pass
    params_prepared=True so weight padding / bf16 casting isn't redone per call.
    compute_dtype=jnp.bfloat16 (default) feeds bf16 operands to the MXU with f32
    accumulation on all TPU generations; pass jnp.float32 for an all-f32 path.
    """
    if not params_prepared:
        params = prepare_decoder_params(params, compute_dtype)
    w0, b0, w1, b1, w2, b2 = params

    B, dz = x.shape
    if w0.shape[0] != dz:
        raise ValueError(f"params expect dim_z={w0.shape[0]}, got x with {dz}")
    dh_p, dh2_p = w0.shape[1], w1.shape[1]
    dout = w2.shape[1]

    w_dtype = jnp.dtype(w0.dtype)
    w_itemsize = w_dtype.itemsize
    single_buffer = _single_buffer_weights_supported()
    w_buffers = 1 if single_buffer else 2

    budget, vmem_cap = _vmem_budget_bytes()

    # ---- VMEM footprint model: fixed weight/bias residency + per-batch-row cost ----
    dz_vm, dout_vm = _round_up(dz, _LANE), _round_up(dout, _LANE)   # physical VMEM lane padding
    row_mult = 16 if w_itemsize < 4 else 8                          # bf16 sublane packing -> M % 16
    fixed = w_buffers * (_round_up(dz, row_mult) * dh_p
                         + dh_p * dh2_p
                         + dh2_p * dout_vm) * w_itemsize
    fixed += w_buffers * 8 * (dh_p + dh2_p + dout_vm) * 4           # (1, N) biases pad to 8 sublanes
    per_row = 2 * (dz_vm + dout_vm) * 4                             # double-buffered x / out DMA tiles
    per_row += (dh_p + dh2_p + dout_vm) * 4                         # live f32 intermediates
    per_row += (dz_vm + dh_p + dh2_p) * w_itemsize                  # in-kernel casts to MXU dtype

    if fixed > budget:
        # TODO(synk): add a K/N-tiled multi-pass fallback for very large dim_h instead of bailing.
        raise ValueError(
            f"Decoder weights need ~{fixed >> 20} MiB of resident VMEM, over the "
            f"{budget >> 20} MiB budget for this TPU generation; reduce dim_h or use bf16 weights.")

    # ---- batch tile: as large as the budget allows (amortizes ~0.35 us/grid-step overhead) ----
    bt_fit = max(row_mult, (budget - fixed) // per_row // row_mult * row_mult)
    bt = min(_round_up(batch_tile, row_mult), _round_up(B, row_mult), bt_fit)
    bt = max(bt, row_mult)

    # Even out the step count for megacore (v7x shards the 'parallel' batch axis over 2 TCs).
    n_steps = _cdiv(B, bt)
    if n_steps > 1 and n_steps % 2 == 1:
        bt_even = _round_up(_cdiv(B, n_steps + 1), row_mult)
        if bt_even >= row_mult and _cdiv(B, bt_even) == n_steps + 1:
            bt = bt_even
            n_steps += 1

    footprint = fixed + per_row * bt
    vmem_limit = int(min(vmem_cap - (8 << 20),                      # >= 8 MiB headroom (56 MiB on v7x)
                         max(32 << 20, footprint * 1.25 + (4 << 20))))

    if single_buffer:
        def const_spec(shape):
            # Grid-invariant blocks: single-buffer so resident weights don't burn 2x VMEM.
            return pl.BlockSpec(shape, lambda i: (0, 0), pipeline_mode=pl.Buffered(1))
    else:
        def const_spec(shape):
            return pl.BlockSpec(shape, lambda i: (0, 0))

    out = pl.pallas_call(
        decoder_kernel,
        out_shape=jax.ShapeDtypeStruct((B, dout), x.dtype),
        grid=(n_steps,),
        in_specs=[
            # x streamed unpadded: block last dim == full dim_z satisfies the (8,128)
            # rule with no extra HBM pass / inflated DMA for padding.
            pl.BlockSpec((bt, dz), lambda i: (i, 0)),
            const_spec((dz, dh_p)),
            const_spec((1, dh_p)),
            const_spec((dh_p, dh2_p)),
            const_spec((1, dh2_p)),
            const_spec((dh2_p, dout)),
            const_spec((1, dout)),
        ],
        # Output written at its true width: no pad-to-128 + post-kernel slice pass
        # (for this memory-bound MLP the extra HBM pass costs more than masked stores).
        out_specs=pl.BlockSpec((bt, dout), lambda i: (i, 0)),
        compiler_params=pltpu.CompilerParams(
            dimension_semantics=("parallel",),   # batch axis shards across TCs on v7x
            vmem_limit_bytes=vmem_limit,
        ),
    )(x, w0, b0, w1, b1, w2, b2)
    return out


# ---------------------------------------------------------------------------
# Reference / parameter init
# ---------------------------------------------------------------------------
def init_decoder_params(key, dim_input, dim_z, dim_h, dtype=jnp.float32):
    """Deterministic synthetic params mirroring nn.Linear shapes.

    PyTorch stores weight as (out, in); we store the transpose (in, out)."""
    ks = jax.random.split(key, 6)

    def lin(kw, kb, fan_in, fan_out):
        bound = 1.0 / jnp.sqrt(fan_in)
        w = jax.random.uniform(kw, (fan_in, fan_out), dtype, -bound, bound)
        b = jax.random.uniform(kb, (1, fan_out), dtype, -bound, bound)
        return w, b

    w0, b0 = lin(ks[0], ks[1], dim_z, dim_h)
    w1, b1 = lin(ks[2], ks[3], dim_h, dim_h * 2)
    w2, b2 = lin(ks[4], ks[5], dim_h * 2, dim_input)
    return (w0, b0, w1, b1, w2, b2)


def decoder_reference(x, params):
    w0, b0, w1, b1, w2, b2 = params
    h = jax.nn.relu(x @ w0 + b0)
    h = jax.nn.relu(h @ w1 + b1)
    h = jax.nn.relu(h @ w2 + b2)
    return h


if __name__ == "__main__":
    # Small shapes consistent with the module's forward: x is (batch, dim_z).
    batch, dim_z, dim_h, dim_input = 64, 16, 32, 64

    key = jax.random.PRNGKey(0)
    k_x, k_p = jax.random.split(key)
    x = jax.random.normal(k_x, (batch, dim_z), jnp.float32)
    params = init_decoder_params(k_p, dim_input, dim_z, dim_h)

    ref = decoder_reference(x, params)

    # f32 MXU operands, small batch tile so the grid has several steps and the pipeline cycles.
    params_f32 = prepare_decoder_params(params, compute_dtype=jnp.float32)
    out_f32 = jax.block_until_ready(
        decoder_forward(x, params_f32, batch_tile=16, params_prepared=True))
    assert out_f32.shape == (batch, dim_input)
    assert jnp.allclose(out_f32, ref, atol=1e-5, rtol=1e-5), "f32 Pallas kernel mismatch vs reference"

    # Default path: bf16 MXU operands (recommended on v5e/v6e/v7x), f32 accumulation,
    # params prepared once outside the per-call path, VMEM-derived batch tile.
    params_bf16 = prepare_decoder_params(params, compute_dtype=jnp.bfloat16)
    out_bf16 = jax.block_until_ready(
        decoder_forward(x, params_bf16, params_prepared=True))
    assert out_bf16.shape == (batch, dim_input)
    rel_err = float(jnp.max(jnp.abs(out_bf16 - ref)) / (jnp.max(jnp.abs(ref)) + 1e-6))
    assert rel_err < 2.5e-2, f"bf16 Pallas kernel relative error too large: {rel_err}"

    # Convenience path: raw params prepared internally (one-off use).
    out_raw = jax.block_until_ready(decoder_forward(x, params, batch_tile=32))
    assert out_raw.shape == (batch, dim_input)

    print("KERNEL_OK")
</pallas_src>

<mosaic_0001>
module attributes {stable_mosaic.version = 11 : i64} {
  func.func @_probe_kernel(%arg0: i32, %arg1: memref<8x128xf32, #tpu.memory_space<vmem>>, %arg2: memref<8x128xf32, #tpu.memory_space<vmem>>) attributes {dimension_semantics = [#tpu.dimension_semantics<arbitrary>], iteration_bounds = array<i64: 2>, scalar_prefetch = 0 : i64, scratch_operands = 0 : i64, tpu.core_type = #tpu.core_type<tc>, window_params = [{pipeline_mode = #tpu.pipeline_mode<synchronous>, transform_indices = @transform_0, window_bounds = array<i64: 8, 128>}, {transform_indices = @transform_1, window_bounds = array<i64: 8, 128>}]} {
    %c0 = arith.constant 0 : index
    %c0_0 = arith.constant 0 : index
    %0 = vector.load %arg1[%c0, %c0_0] : memref<8x128xf32, #tpu.memory_space<vmem>>, vector<8x128xf32>
    %cst = arith.constant 1.000000e+00 : f32
    %1 = vector.broadcast %cst : f32 to vector<8x128xf32>
    %2 = arith.addf %0, %1 : vector<8x128xf32>
    %c0_1 = arith.constant 0 : index
    %c0_2 = arith.constant 0 : index
    %3 = vector.load %arg2[%c0_1, %c0_2] : memref<8x128xf32, #tpu.memory_space<vmem>>, vector<8x128xf32>
    tpu.vector_store %arg2[%c0_1, %c0_2], %2 {strides = array<i32>} : memref<8x128xf32, #tpu.memory_space<vmem>>, vector<8x128xf32>,
    return
  }
  func.func @transform_0(%arg0: i32) -> (i32, i32) {
    %c0_i32 = arith.constant 0 : i32
    %c0_i32_0 = arith.constant 0 : i32
    %c0_i32_1 = arith.constant 0 : i32
    return %c0_i32, %c0_i32_0 : i32, i32
  }
  func.func @transform_1(%arg0: i32) -> (i32, i32) {
    %c0_i32 = arith.constant 0 : i32
    %c0_i32_0 = arith.constant 0 : i32
    return %arg0, %c0_i32 : i32, i32
  }
}

module attributes {stable_mosaic.version = 11 : i64} {
  func.func @decoder_kernel(%arg0: i32, %arg1: memref<16x16xf32, #tpu.memory_space<vmem>>, %arg2: memref<16x128xf32, #tpu.memory_space<vmem>>, %arg3: memref<1x128xf32, #tpu.memory_space<vmem>>, %arg4: memref<128x128xf32, #tpu.memory_space<vmem>>, %arg5: memref<1x128xf32, #tpu.memory_space<vmem>>, %arg6: memref<128x64xf32, #tpu.memory_space<vmem>>, %arg7: memref<1x64xf32, #tpu.memory_space<vmem>>, %arg8: memref<16x64xf32, #tpu.memory_space<vmem>>) attributes {dimension_semantics = [#tpu.dimension_semantics<parallel>], iteration_bounds = array<i64: 4>, scalar_prefetch = 0 : i64, scratch_operands = 0 : i64, tpu.core_type = #tpu.core_type<tc>, window_params = [{transform_indices = @transform_0, window_bounds = array<i64: 16, 16>}, {pipeline_mode = #tpu.pipeline_mode<synchronous>, transform_indices = @transform_1, window_bounds = array<i64: 16, 128>}, {pipeline_mode = #tpu.pipeline_mode<synchronous>, transform_indices = @transform_2, window_bounds = array<i64: 1, 128>}, {pipeline_mode = #tpu.pipeline_mode<synchronous>, transform_indices = @transform_3, window_bounds = array<i64: 128, 128>}, {pipeline_mode = #tpu.pipeline_mode<synchronous>, transform_indices = @transform_4, window_bounds = array<i64: 1, 128>}, {pipeline_mode = #tpu.pipeline_mode<synchronous>, transform_indices = @transform_5, window_bounds = array<i64: 128, 64>}, {pipeline_mode = #tpu.pipeline_mode<synchronous>, transform_indices = @transform_6, window_bounds = array<i64: 1, 64>}, {transform_indices = @transform_7, window_bounds = array<i64: 16, 64>}]} {
    %c0 = arith.constant 0 : index
    %c0_0 = arith.constant 0 : index
    %0 = vector.load %arg1[%c0, %c0_0] : memref<16x16xf32, #tpu.memory_space<vmem>>, vector<16x16xf32>
    %c0_1 = arith.constant 0 : index
    %c0_2 = arith.constant 0 : index
    %1 = vector.load %arg2[%c0_1, %c0_2] : memref<16x128xf32, #tpu.memory_space<vmem>>, vector<16x128xf32>
    %cst = arith.constant dense<0.000000e+00> : vector<16x128xf32>
    %2 = tpu.matmul %0, %1, %cst {dimension_numbers = #tpu.dot_dimension_numbers<[1], [0], [0], [1], [0, 0, 1, 1], [], []>} : vector<16x16xf32>, vector<16x128xf32>, vector<16x128xf32> -> vector<16x128xf32>
    %c0_3 = arith.constant 0 : index
    %c0_4 = arith.constant 0 : index
    %3 = vector.load %arg3[%c0_3, %c0_4] : memref<1x128xf32, #tpu.memory_space<vmem>>, vector<1x128xf32>
    %4 = vector.broadcast %3 : vector<1x128xf32> to vector<16x128xf32>
    %5 = arith.addf %2, %4 : vector<16x128xf32>
    %cst_5 = arith.constant 0.000000e+00 : f32
    %6 = vector.broadcast %cst_5 : f32 to vector<16x128xf32>
    %7 = arith.maximumf %5, %6 : vector<16x128xf32>
    %c0_6 = arith.constant 0 : index
    %c0_7 = arith.constant 0 : index
    %8 = vector.load %arg4[%c0_6, %c0_7] : memref<128x128xf32, #tpu.memory_space<vmem>>, vector<128x128xf32>
    %cst_8 = arith.constant dense<0.000000e+00> : vector<16x128xf32>
    %9 = tpu.matmul %7, %8, %cst_8 {dimension_numbers = #tpu.dot_dimension_numbers<[1], [0], [0], [1], [0, 0, 1, 1], [], []>} : vector<16x128xf32>, vector<128x128xf32>, vector<16x128xf32> -> vector<16x128xf32>
    %c0_9 = arith.constant 0 : index
    %c0_10 = arith.constant 0 : index
    %10 = vector.load %arg5[%c0_9, %c0_10] : memref<1x128xf32, #tpu.memory_space<vmem>>, vector<1x128xf32>
    %11 = vector.broadcast %10 : vector<1x128xf32> to vector<16x128xf32>
    %12 = arith.addf %9, %11 : vector<16x128xf32>
    %cst_11 = arith.constant 0.000000e+00 : f32
    %13 = vector.broadcast %cst_11 : f32 to vector<16x128xf32>
    %14 = arith.maximumf %12, %13 : vector<16x128xf32>
    %c0_12 = arith.constant 0 : index
    %c0_13 = arith.constant 0 : index
    %15 = vector.load %arg6[%c0_12, %c0_13] : memref<128x64xf32, #tpu.memory_space<vmem>>, vector<128x64xf32>
    %cst_14 = arith.constant dense<0.000000e+00> : vector<16x64xf32>
    %16 = tpu.matmul %14, %15, %cst_14 {dimension_numbers = #tpu.dot_dimension_numbers<[1], [0], [0], [1], [0, 0, 1, 1], [], []>} : vector<16x128xf32>, vector<128x64xf32>, vector<16x64xf32> -> vector<16x64xf32>
    %c0_15 = arith.constant 0 : index
    %c0_16 = arith.constant 0 : index
    %17 = vector.load %arg7[%c0_15, %c0_16] : memref<1x64xf32, #tpu.memory_space<vmem>>, vector<1x64xf32>
    %18 = vector.broadcast %17 : vector<1x64xf32> to vector<16x64xf32>
    %19 = arith.addf %16, %18 : vector<16x64xf32>
    %cst_17 = arith.constant 0.000000e+00 : f32
    %20 = vector.broadcast %cst_17 : f32 to vector<16x64xf32>
    %21 = arith.maximumf %19, %20 : vector<16x64xf32>
    %c0_18 = arith.constant 0 : index
    %c0_19 = arith.constant 0 : index
    %22 = vector.load %arg8[%c0_18, %c0_19] : memref<16x64xf32, #tpu.memory_space<vmem>>, vector<16x64xf32>
    tpu.vector_store %arg8[%c0_18, %c0_19], %21 {strides = array<i32>} : memref<16x64xf32, #tpu.memory_space<vmem>>, vector<16x64xf32>,
    return
  }
  func.func @transform_0(%arg0: i32) -> (i32, i32) {
    %c0_i32 = arith.constant 0 : i32
    %c0_i32_0 = arith.constant 0 : i32
    return %arg0, %c0_i32 : i32, i32
  }
  func.func @transform_1(%arg0: i32) -> (i32, i32) {
    %c0_i32 = arith.constant 0 : i32
    %c0_i32_0 = arith.constant 0 : i32
    %c0_i32_1 = arith.constant 0 : i32
    return %c0_i32, %c0_i32_0 : i32, i32
  }
  func.func @transform_2(%arg0: i32) -> (i32, i32) {
    %c0_i32 = arith.constant 0 : i32
    %c0_i32_0 = arith.constant 0 : i32
    %c0_i32_1 = arith.constant 0 : i32
    return %c0_i32, %c0_i32_0 : i32, i32
  }
  func.func @transform_3(%arg0: i32) -> (i32, i32) {
    %c0_i32 = arith.constant 0 : i32
    %c0_i32_0 = arith.constant 0 : i32
    %c0_i32_1 = arith.constant 0 : i32
    return %c0_i32, %c0_i32_0 : i32, i32
  }
  func.func @transform_4(%arg0: i32) -> (i32, i32) {
    %c0_i32 = arith.constant 0 : i32
    %c0_i32_0 = arith.constant 0 : i32
    %c0_i32_1 = arith.constant 0 : i32
    return %c0_i32, %c0_i32_0 : i32, i32
  }
  func.func @transform_5(%arg0: i32) -> (i32, i32) {
    %c0_i32 = arith.constant 0 : i32
    %c0_i32_0 = arith.constant 0 : i32
    %c0_i32_1 = arith.constant 0 : i32
    return %c0_i32, %c0_i32_0 : i32, i32
  }
  func.func @transform_6(%arg0: i32) -> (i32, i32) {
    %c0_i32 = arith.constant 0 : i32
    %c0_i32_0 = arith.constant 0 : i32
    %c0_i32_1 = arith.constant 0 : i32
    return %c0_i32, %c0_i32_0 : i32, i32
  }
  func.func @transform_7(%arg0: i32) -> (i32, i32) {
    %c0_i32 = arith.constant 0 : i32
    %c0_i32_0 = arith.constant 0 : i32
    return %arg0, %c0_i32 : i32, i32
  }
}

</mosaic_0001>

<bundles_post_ra>
// kernel: tpu_custom_call.1
= control target key start
LH: loop header
LB: loop body
LE: loop exit
PB: predicated region body
PF: predicated region fallthrough
CT: control target
= control target key end

     0   :  { %6 = vsyncpa [#allocation3], 0  ;;  %s482_s0 = inlined_call_operand.hbm [shape: f32[8,128], index: 0, kind: input, shape index: {}]   ;;  %s483_s1 = inlined_call_operand.hbm [shape: f32[16,128], index: 1, kind: output, shape index: {}]  }
   0x1   :  { %7 = vsyncpa [#allocation4], 0 }
   0x2   :  { %9 = vsyncpa [#allocation4 + $0x1], 0  ;;  %s352_s6 = smov 0   ;;  %s354_s7 = smov 0  }
   0x3   :  { %s356_s8 = smov 0   ;;  %s358_s9 = smov 0  }
   0x4 LB: > { %s373_s10 = sadd.s32 4294967295, %s338_s9   ;;  %s184_s11 = sadd.s32 4294967294, %s338_s9   ;;  %s338_s9 = sphi %s358_s9, %s499_s9   ;;  %s334_s8 = sphi %s356_s8, %s498_s8   ;;  %s330_s7 = sphi %s354_s7, %s497_s7   ;;  %s326_s6 = sphi %s352_s6, %s496_s6  }
   0x5   : > { %s377_s12 = sadd.s32 1, %s338_s9   ;;  %s43_s13 = sadd.s32 1, %s334_s8 }
   0x6   : > { %s40_s14 = ssub.s32 %s338_s9, %s377_s12  ;;  %p53_p0 = scmp.ne.s32.totalorder %s334_s8, %s330_s7 }
   0x7   : > { %p41_p1 = scmp.eq.s32.totalorder %s40_s14, 0  ;;  %p54_p2 = scmp.eq.s32.totalorder %s373_s10, 1 }
   0x8   : > { %p59_p3 = scmp.ne.s32.totalorder %s330_s7, %s326_s6  ;;  %p60_p4 = scmp.eq.s32.totalorder %s184_s11, 1 }
   0x9   : > { %s388_s15 = scalar_select %p41_p1, %s334_s8, %s43_s13  }
   0xa   : > { %p390_p5 = por %p54_p2, %p53_p0  ;;  %p394_p6 = por %p60_p4, %p59_p3 }
   0xb   : > { %p185_p7 = scmp.ge.s32.totalorder %s338_s9, 1  ;;  %p67_p8 = scmp.lt.s32.totalorder %s338_s9, 3 }
   0xc   : > { %s487_s16 = scalar_select %p390_p5, 1, 0 }
   0xd   : > { %s488_s17 = scalar_select %p394_p6, 1, 0 }
   0xe   : > { %p484_p9 = scmp.eq.s32.totalorder %s373_s10, 0  ;;  %p401_p10 = pnand %p185_p7, %p67_p8 }
   0xf   : > { %s340_s19 = smov [#allocation2]   ;;  %s244_s24 = scalar_lea.hbm %s482_s0, 128 }
  0x10   : > { %s489_s18 = scalar_select %p401_p10, 1, 0 }
  0x11   : > { %s80_s20 = sshll.u32 %s340_s19, 4  ;;  %p200_p11 = pneg %p401_p10  ;;  %s81_s20 = int_to_ptr.vmem [resolvable:$true] %s80_s20 }
  0x12   : > { %p245_p13 = scmp.ne.s32.totalorder %s482_s0, %s244_s24  ;;  %p251_p3 = scmp.lt.u32.totalorder %s244_s24, %s482_s0 }
  0x13   : > { %p409_p12 = pnand %p484_p9, %p200_p11 }
  0x15   : > { %p246_p0 = pneg %p409_p12 }
  0x17   : > { %p247_p1 = pnand %p246_p0, %p245_p13 }
  0x19   : > { %p248_p2 = pneg %p247_p1 }
  0x1b   : > { %p253_p4 = pnand %p251_p3, %p248_p2 }
  0x1d   : > { %256 = shalt.err (!%p253_p4)
}
  0x1e   : > { %s257_s29 = scalar_lea.vmem %s81_s20, 128  ;;  %p265_p9 = scmp.lt.s32.totalorder %s81_s20, %s81_s20 }
  0x1f   : > { %p258_p7 = scmp.ne.s32.totalorder %s81_s20, %s257_s29  ;;  %p266_p6 = scmp.lt.s32.totalorder %s257_s29, %s257_s29 }
  0x21   : > { %p260_p8 = pnand %p258_p7, %p246_p0  ;;  %p267_p5 = por %p266_p6, %p265_p9 }
  0x23   : > { %p261_p11 = pneg %p260_p8 }
  0x25   : > { %p268_p10 = pnand %p267_p5, %p261_p11 }
  0x27   : > { %271 = shalt.err (!%p268_p10)
}
  0x28   : > { %203 = dma.hbm_to_vmem [thread:$0]  (!%p409_p12), %s482_s0, 128, %s81_s20, [#allocation3]  }
  0x29   : > { %p491_p13 = scmp.ne.s32.totalorder %s489_s18, 0 }
  0x2a   : > { %p492_p1 = scmp.eq.s32.totalorder (!%p491_p13), %s373_s10, 0 }
  0x2b   : > { %93 = sbr.rel (%p491_p13) target bundleno = 77 (0x4d), region = 24 }
  0x32   : > { %317 = dma.done.wait (%p492_p1), [#allocation3], 128   ;;  %p493_p0 = pmov %p492_p1 }
  0x33   : > { %s105_s3 = sand.u32 1, %s330_s7   ;;  %s191_s13 = sshll.u32 %s373_s10, 7  ;;  %v108_v0 = vld [vmem:[#allocation2] sm:$0xff] }
  0x34   : > { %319 = vsyncadd (%p493_p0), [#allocation3], 4294967168  ;;  %s189_s4 = sshll.u32 %s105_s3, 3  ;;  %v109_v1 = vadd.f32 1.0, %v108_v0  ;;  %s442_s19 = scalar_lea.hbm %s483_s1, %s191_s13 }
  0x35   : > { %s107_s5 = scalar_lea.vmem [#allocation5], %s189_s4  ;;  %s112_s20 = scalar_lea.sflag [#allocation4], %s105_s3 }
  0x36   : > { %s125_s11 = sshll.u32 %s107_s5, 4  ;;  %110 = vst [vmem:[%s107_s5] sm:$0xff] %v109_v1  ;;  %p494_p6 = scmp.ne.s32.totalorder %s487_s16, 0  ;;  %s437_s11 = int_to_ptr.vmem [resolvable:$true] %s125_s11 }
  0x37   : > { %s272_s21 = scalar_lea.vmem %s437_s11, 128  ;;  %s341_s10 = smov [#allocation5]  }
  0x38   : > { %p273_p5 = scmp.ne.s32.totalorder %s437_s11, %s272_s21  ;;  %s276_s22 = sshll.u32 %s341_s10, 4  ;;  %s277_s22 = int_to_ptr.vmem [resolvable:$false] %s276_s22 }
  0x39   : > { %s278_s23 = scalar_lea.vmem %s277_s22, 256  ;;  %p279_p12 = scmp.lt.s32.totalorder %s437_s11, %s277_s22 }
  0x3a   : > { %p274_p9 = pnand %p273_p5, %p494_p6  ;;  %p280_p2 = scmp.lt.s32.totalorder %s278_s23, %s272_s21 }
  0x3c   : > { %p275_p10 = pneg %p274_p9  ;;  %p281_p3 = por %p280_p2, %p279_p12 }
  0x3e   : > { %p282_p4 = pnand %p281_p3, %p275_p10 }
  0x40   : > { %285 = shalt.err (!%p282_p4)
}
  0x41   : > { %s286_s24 = scalar_lea.hbm %s442_s19, 128  ;;  %s290_s27 = scalar_lea.hbm %s483_s1, 256 }
  0x42   : > { %p287_p7 = scmp.ne.s32.totalorder %s442_s19, %s286_s24  ;;  %p291_p13 = scmp.lt.u32.totalorder %s442_s19, %s483_s1 }
  0x43   : > { %p292_p1 = scmp.lt.u32.totalorder %s290_s27, %s286_s24  ;;  %p294_p5 = scmp.lt.u32.totalorder %s286_s24, %s442_s19 }
  0x44   : > { %p288_p8 = pnand %p287_p7, %p494_p6 }
  0x45   : > { %p293_p0 = por %p292_p1, %p291_p13 }
  0x46   : > { %p289_p11 = pneg %p288_p8 }
  0x47   : > { %p295_p9 = por %p294_p5, %p293_p0 }
  0x49   : > { %p296_p10 = pnand %p295_p9, %p289_p11 }
  0x4b   : > { %299 = shalt.err (!%p296_p10)
}
  0x4c   : > { %198 = dma.vmem_to_hbm [thread:$0]  (%p494_p6), %s437_s11, 128, %s442_s19, %s112_s20  }
  0x4d PF: > { %p210_p12 = scmp.ge.s32.totalorder %s338_s9, 2  ;;  %s137_s30 = sand.u32 1, %s326_s6  }
  0x4e   : > { %p495_p2 = scmp.ne.s32.totalorder %s488_s17, 0  ;;  %s138_s2 = scalar_lea.sflag [#allocation4], %s137_s30 }
  0x50   : > { %p205_p3 = pnand %p210_p12, %p495_p2 }
  0x52   : > { %321 = dma.done.wait (!%p205_p3), %s138_s2, 128  }
  0x53   : > { %323 = vsyncadd (!%p205_p3), %s138_s2, 4294967168  ;;  %p12_p4 = scmp.ge.s32.totalorder %s377_s12, 4   ;;  %s496_s6 = smov %s330_s7 }
  0x54   : > { %s497_s7 = smov %s334_s8  ;;  %s498_s8 = smov %s388_s15 }
  0x55   : > { %s499_s9 = smov %s377_s12  ;;  %14 = sbr.rel (!%p12_p4) target bundleno = 4 (0x4), region = 61 }
  0x5c   :  { %143 = vsyncpa [#allocation3], 1 }
  0x5d   :  { %145 = vsyncpa [#allocation3 + $0x1], 1 }
  0x5e   :  { %146 = vsyncpa [#allocation4], 1 }
  0x5f   :  { %148 = vsyncpa [#allocation4 + $0x1], 1 }

// kernel: tpu_custom_call.1
= control target key start
LH: loop header
LB: loop body
LE: loop exit
PB: predicated region body
PF: predicated region fallthrough
CT: control target
= control target key end

     0   :  { %12 = vsyncpa [#allocation3], 0  ;;  %s1218_s0 = inlined_call_operand.vmem [shape: f32[64,16], index: 0, kind: input, shape index: {}]   ;;  %s1219_s1 = inlined_call_operand.vmem [shape: f32[16,128], index: 1, kind: input, shape index: {}]   ;;  %s1220_s2 = inlined_call_operand.vmem [shape: f32[1,128], index: 2, kind: input, shape index: {}]   ;;  %s1221_s3 = inlined_call_operand.vmem [shape: f32[128,128], index: 3, kind: input, shape index: {}]   ;;  %s1222_s4 = inlined_call_operand.vmem [shape: f32[1,128], index: 4, kind: input, shape index: {}]   ;;  %s1223_s5 = inlined_call_operand.vmem [shape: f32[128,64], index: 5, kind: input, shape index: {}]   ;;  %s1224_s6 = inlined_call_operand.vmem [shape: f32[1,64], index: 6, kind: input, shape index: {}]   ;;  %s1225_s7 = inlined_call_operand.hbm [shape: f32[64,64], index: 7, kind: output, shape index: {}]  }
   0x1   :  { %14 = vsyncpa [#allocation3 + $0x1], 0  ;;  %s1005_s24 = smov 0   ;;  %s1007_s25 = smov 0  }
   0x2   :  { %s1009_s26 = smov 0   ;;  %s1011_s27 = smov 0  }
   0x3 LB: > { %s1026_s28 = sadd.s32 4294967295, %s960_s27   ;;  %s654_s29 = sadd.s32 4294967294, %s960_s27   ;;  %s960_s27 = sphi %s1011_s27, %s1231_s27   ;;  %s956_s26 = sphi %s1009_s26, %s1230_s26   ;;  %s952_s25 = sphi %s1007_s25, %s1229_s25   ;;  %s948_s24 = sphi %s1005_s24, %s1228_s24  }
   0x4   : > { %s1030_s30 = sadd.s32 1, %s960_s27   ;;  %s179_s8 = sadd.s32 1, %s956_s26 }
   0x5   : > { %s176_s9 = ssub.s32 %s960_s27, %s1030_s30  ;;  %p189_p0 = scmp.ne.s32.totalorder %s956_s26, %s952_s25 }
   0x6   : > { %p177_p1 = scmp.eq.s32.totalorder %s176_s9, 0  ;;  %p190_p2 = scmp.eq.s32.totalorder %s1026_s28, 3 }
   0x7   : > { %p195_p3 = scmp.ne.s32.totalorder %s952_s25, %s948_s24  ;;  %p196_p4 = scmp.eq.s32.totalorder %s654_s29, 3 }
   0x8   : > { %s1041_s10 = scalar_select %p177_p1, %s956_s26, %s179_s8  }
   0x9   : > { %p1043_p5 = por %p190_p2, %p189_p0  ;;  %p1047_p6 = por %p196_p4, %p195_p3 }
   0xa   : > { %p657_p7 = scmp.ge.s32.totalorder %s960_s27, 1  ;;  %p241_p8 = scmp.lt.s32.totalorder %s960_s27, 5 }
   0xc   : > { %p242_p9 = pnand %p657_p7, %p241_p8 }
   0xd   : > { %v282_v0 = vld [vmem:[%s1219_s1] sm:$0xff] (!%p242_p9)  ;;  %v283_v1 = vld [vmem:[%s1219_s1 + $0x8] sm:$0xff] (!%p242_p9)  ;;  %s659_s17 = sshll.u32 (!%p242_p9), %s1026_s28, 1  ;;  %v377_v5 = vld [vmem:[%s1221_s3 + $0x10] sm:$0xff] (!%p242_p9)  ;;  %vm291_vm0 = vcmask (!%p242_p9), 130048   ;;  %s270_s21 = sand.u32 (!%p242_p9), 1, %s952_s25  }
   0xe   : > { %245 = sbr.rel (%p242_p9) target bundleno = 694 (0x2b6), region = 48  ;;  %v375_v2 = vld [vmem:[%s1221_s3] sm:$0xff] (!%p242_p9)  ;;  %v789_v3 = vpack.c.bf16 (!%p242_p9), %v283_v1, %v282_v0  ;;  %p274_p10 = scmp.lt.s32.totalorder (!%p242_p9), %s659_s17, 7  ;;  %v376_v4 = vld [vmem:[%s1221_s3 + $0x8] sm:$0xff] (!%p242_p9)  ;;  %v378_v6 = vld [vmem:[%s1221_s3 + $0x18] sm:$0xff] (!%p242_p9)  ;;  %vm575_vm1 = vcmask (!%p242_p9), 523264  }
   0xf   : > { %v793_v7 = vpack.c.bf16 (!%p242_p9), %v376_v4, %v375_v2  ;;  %v797_v8 = vpack.c.bf16 (!%p242_p9), %v378_v6, %v377_v5  ;;  %v379_v9 = vld [vmem:[%s1221_s3 + $0x20] sm:$0xff] (!%p242_p9)  ;;  %v380_v10 = vld [vmem:[%s1221_s3 + $0x28] sm:$0xff] (!%p242_p9)  ;;  %v381_v12 = vld [vmem:[%s1221_s3 + $0x30] sm:$0xff] (!%p242_p9)  ;;  %s658_s22 = sshll.u32 (!%p242_p9), %s270_s21, 4  ;;  %s671_s9 = sshll.u32 (!%p242_p9), %s1026_s28, 8 }
  0x10   : > { %790 = vmatprep.subr.bf16.mxu0 (!%p242_p9), %v789_v3  ;;  %v801_v11 = vpack.c.bf16 (!%p242_p9), %v380_v10, %v379_v9  ;;  %v382_v15 = vld [vmem:[%s1221_s3 + $0x38] sm:$0xff] (!%p242_p9)  ;;  %v383_v17 = vld [vmem:[%s1221_s3 + $0x40] sm:$0xff] (!%p242_p9)  ;;  %v384_v18 = vld [vmem:[%s1221_s3 + $0x48] sm:$0xff] (!%p242_p9)  ;;  %s1175_s15 = scalar_lea.hbm (!%p242_p9), %s1225_s7, %s671_s9  ;;  %s962_s18 = smov (!%p242_p9), [#allocation2]  }
  0x11   : > { %792 = vmatpush3.bf16.msra.mxu0 (!%p242_p9), %v789_v3  ;;  %794 = vmatprep.subr.bf16.mxu1 (!%p242_p9), %v793_v7  ;;  %v805_v16 = vpack.c.bf16 (!%p242_p9), %v382_v15, %v381_v12  ;;  %v809_v19 = vpack.c.bf16 (!%p242_p9), %v384_v18, %v383_v17  ;;  %v385_v20 = vld [vmem:[%s1221_s3 + $0x50] sm:$0xff] (!%p242_p9)  ;;  %v386_v21 = vld [vmem:[%s1221_s3 + $0x58] sm:$0xff] (!%p242_p9)  ;;  %v387_v23 = vld [vmem:[%s1221_s3 + $0x60] sm:$0xff] (!%p242_p9)  ;;  %s902_s19 = sshll.u32 (!%p242_p9), %s962_s18, 4  ;;  %s903_s19 = int_to_ptr.vmem [resolvable:$false] %s902_s19 }
  0x12   : > { %796 = vmatpush3.bf16.msra.mxu1 (!%p242_p9), %v793_v7  ;;  %v813_v22 = vpack.c.bf16 (!%p242_p9), %v386_v21, %v385_v20  ;;  %v388_v24 = vld [vmem:[%s1221_s3 + $0x68] sm:$0xff] (!%p242_p9)  ;;  %v389_v26 = vld [vmem:[%s1221_s3 + $0x70] sm:$0xff] (!%p242_p9)  ;;  %v390_v27 = vld [vmem:[%s1221_s3 + $0x78] sm:$0xff] (!%p242_p9) }
  0x13   : > { %798 = vmatprep.subr.bf16.mxu1 (!%p242_p9), %v797_v8  ;;  %v817_v25 = vpack.c.bf16 (!%p242_p9), %v388_v24, %v387_v23  ;;  %v821_v28 = vpack.c.bf16 (!%p242_p9), %v390_v27, %v389_v26  ;;  %v475_v29 = vld [vmem:[%s1223_s5] sm:$0xff] (!%p242_p9)  ;;  %v476_v30 = vld [vmem:[%s1223_s5 + $0x8] sm:$0xff] (!%p242_p9)  ;;  %v477_v31 = vld [vmem:[%s1223_s5 + $0x10] sm:$0xff] (!%p242_p9) }
  0x14   : > { %v825_v32 = vpack.c.bf16 (!%p242_p9), %v476_v30, %v475_v29  ;;  %v478_v33 = vld [vmem:[%s1223_s5 + $0x18] sm:$0xff] (!%p242_p9)  ;;  %v479_v35 = vld [vmem:[%s1223_s5 + $0x20] sm:$0xff] (!%p242_p9)  ;;  %v480_v36 = vld [vmem:[%s1223_s5 + $0x28] sm:$0xff] (!%p242_p9) }
  0x15   : > { %s1233_s17 = smov (!%p274_p10, %s659_s17), 7  ;;  %v829_v34 = vpack.c.bf16 %v478_v33, %v477_v31  ;;  %v833_v37 = vpack.c.bf16 %v480_v36, %v479_v35  ;;  %v481_v38 = vld [vmem:[%s1223_s5 + $0x30] sm:$0xff]  ;;  %v482_v39 = vld [vmem:[%s1223_s5 + $0x38] sm:$0xff]  ;;  %v483_v41 = vld [vmem:[%s1223_s5 + $0x40] sm:$0xff] }
  0x16   : > { %s660_s16 = sshll.u32 %s1233_s17, 3  ;;  %800 = vmatpush3.bf16.msra.mxu1 %v797_v8  ;;  %826 = vmatprep.subr.bf16.mxu0 %v825_v32  ;;  %v837_v40 = vpack.c.bf16 %v482_v39, %v481_v38  ;;  %v484_v42 = vld [vmem:[%s1223_s5 + $0x48] sm:$0xff]  ;;  %v485_v44 = vld [vmem:[%s1223_s5 + $0x50] sm:$0xff]  ;;  %v486_v45 = vld [vmem:[%s1223_s5 + $0x58] sm:$0xff]  ;;  %s272_s17 = scalar_lea.vmem [#allocation2], %s658_s22 }
  0x17   : > { %s277_s20 = scalar_lea.vmem %s1218_s0, %s660_s16  ;;  %802 = vmatprep.subr.bf16.mxu1 %v801_v11  ;;  %v841_v43 = vpack.c.bf16 %v484_v42, %v483_v41  ;;  %v845_v46 = vpack.c.bf16 %v486_v45, %v485_v44  ;;  %v487_v47 = vld [vmem:[%s1223_s5 + $0x60] sm:$0xff]  ;;  %v488_v48 = vld [vmem:[%s1223_s5 + $0x68] sm:$0xff]  ;;  %v489_v57 = vld [vmem:[%s1223_s5 + $0x70] sm:$0xff]  ;;  %s592_s8 = sshll.u32 %s272_s17, 4  ;;  %s1170_s8 = int_to_ptr.vmem [resolvable:$true] %s592_s8 }
  0x18   : > { %v280_v13 = vld [vmem:[%s277_s20] sm:$0xff]  ;;  %v281_v14 = vld [vmem:[%s277_s20 + $0x8] sm:$0xff]  ;;  %v849_v49 = vpack.c.bf16 %v488_v48, %v487_v47  ;;  %v490_v58 = vld [vmem:[%s1223_s5 + $0x78] sm:$0xff]  ;;  %s1177_s16 = scalar_lea.sflag [#allocation3], %s270_s21  ;;  %s898_s28 = scalar_lea.vmem %s1170_s8, 256 }
  0x19   : > { %716 = vmatprep.mubr.msk.f32.mxu0 %vm291_vm0, %v280_v13  ;;  %v661_v50 = vld [vmem:[%s1220_s2] ss:$0 sm:$0xff]  ;;  %v853_v59 = vpack.c.bf16 %v490_v58, %v489_v57  ;;  %p899_p11 = scmp.ne.s32.totalorder %s1170_s8, %s898_s28  ;;  %s904_s20 = scalar_lea.vmem %s903_s19, 512 }
  0x1a   : > { %717 = vmatmul.mubr.msk.f32.vlgmr.msra.gmra.mrb[0].mxu0 %vm291_vm0, %v281_v14  ;;  %804 = vmatpush3.bf16.msra.mxu1 %v801_v11  ;;  %v664_v60 = vld [vmem:[%s1222_s4] ss:$0 sm:$0xff]  ;;  %p905_p0 = scmp.lt.s32.totalorder %s1170_s8, %s903_s19  ;;  %p906_p1 = scmp.lt.s32.totalorder %s904_s20, %s898_s28 }
  0x1b   : > { %806 = vmatprep.subr.bf16.mxu1 %v805_v16  ;;  %828 = vmatpush3.bf16.msra.mxu0 %v825_v32  ;;  %v665_v3 = vld [vmem:[%s1224_s6] ss:$0 sm:$0xff]  ;;  %p900_p12 = pnand %p899_p11, %p1043_p5 }
  0x1c   : > { %830 = vmatprep.subr.bf16.mxu0 %v829_v34  ;;  %p907_p2 = por %p906_p1, %p905_p0 }
  0x1d   : > { %p901_p13 = pneg %p900_p12 }
  0x1e   : > { %808 = vmatpush3.bf16.msra.mxu1 %v805_v16 }
  0x1f   : > { %810 = vmatprep.subr.bf16.mxu1 %v809_v19  ;;  %832 = vmatpush3.bf16.msra.mxu0 %v829_v34  ;;  %p908_p3 = pnand %p907_p2, %p901_p13 }
  0x20   : > { %834 = vmatprep.subr.bf16.mxu0 %v833_v37 }
  0x22   : > { %812 = vmatpush3.bf16.msra.mxu1 %v809_v19 }
  0x23   : > { %814 = vmatprep.subr.bf16.mxu1 %v813_v22  ;;  %836 = vmatpush3.bf16.msra.mxu0 %v833_v37 }
  0x24   : > { %838 = vmatprep.subr.bf16.mxu0 %v837_v40 }
  0x26   : > { %816 = vmatpush3.bf16.msra.mxu1 %v813_v22 }
  0x27   : > { %818 = vmatprep.subr.bf16.mxu1 %v817_v25  ;;  %840 = vmatpush3.bf16.msra.mxu0 %v837_v40 }
  0x28   : > { %842 = vmatprep.subr.bf16.mxu0 %v841_v43 }
  0x2a   : > { %820 = vmatpush3.bf16.msra.mxu1 %v817_v25 }
  0x2b   : > { %822 = vmatprep.subr.bf16.mxu1 %v821_v28  ;;  %844 = vmatpush3.bf16.msra.mxu0 %v841_v43 }
  0x2c   : > { %846 = vmatprep.subr.bf16.mxu0 %v845_v46 }
  0x2e   : > { %824 = vmatpush3.bf16.msra.mxu1 %v821_v28 }
  0x2f   : > { %848 = vmatpush3.bf16.msra.mxu0 %v845_v46 }
  0x30   : > { %850 = vmatprep.subr.bf16.mxu0 %v849_v49 }
  0x33   : > { %852 = vmatpush3.bf16.msra.mxu0 %v849_v49 }
  0x34   : > { %854 = vmatprep.subr.bf16.mxu0 %v853_v59 }
  0x37   : > { %856 = vmatpush3.bf16.msra.mxu0 %v853_v59 }
  0xed   : > { %v718_v51 = vpop.f32.mrb[0].mxu0 }
  0xee   : > { %v370_v52 = vadd.f32 %v718_v51, %v661_v50  ;;  %v364_v53 = vpop.f32.mrb[1].mxu0 }
  0xef   : > { %v365_v54 = vadd.f32 %v661_v50, %v364_v53 }
  0xf0   : > { %v374_v56 = vmax.f32 %v370_v52, 0.0 }
  0xf1   : > { %v373_v55 = vmax.f32 %v365_v54, 0.0 }
  0xf3   : > { %751 = vmatprep.mubr.f32.mxu1 %v373_v55 }
  0xf4   : > { %752 = vmatmul.mubr.f32.vlgmr.msra.gmra.mrb[0].mxu1 %v374_v56 }
 0x1c7   : > { %v753_v61 = vpop.f32.mrb[0].mxu1 }
 0x1c8   : > { %v470_v62 = vadd.f32 %v753_v61, %v664_v60  ;;  %v464_v63 = vpop.f32.mrb[1].mxu1 }
 0x1c9   : > { %v465_v0 = vadd.f32 %v664_v60, %v464_v63 }
 0x1ca   : > { %v474_v2 = vmax.f32 %v470_v62, 0.0 }
 0x1cb   : > { %v473_v1 = vmax.f32 %v465_v0, 0.0 }
 0x1cd   : > { %786 = vmatprep.mubr.f32.mxu0 %v473_v1 }
 0x1ce   : > { %787 = vmatmul.mubr.f32.vlgmr.msra.gmra.mrb[2].mxu0 %v474_v2 }
 0x2a1   : > { %v788_v4 = vpop.f32.mrb[2].mxu0 }
 0x2a2   : > { %v570_v5 = vadd.f32 %v788_v4, %v665_v3  ;;  %v564_v6 = vpop.f32.mrb[3].mxu0 }
 0x2a3   : > { %v565_v7 = vadd.f32 %v665_v3, %v564_v6 }
 0x2a4   : > { %v574_v8 = vmax.f32 %v570_v5, 0.0 }
 0x2a5   : > { %v573_v9 = vmax.f32 %v565_v7, 0.0 }
 0x2a6   : > { %577 = vst.msk [vmem:[%s272_s17 + $0x8] sm:$0xff] %vm575_vm1, %v574_v8 }
 0x2a7   : > { %576 = vst.msk [vmem:[%s272_s17] sm:$0xff] %vm575_vm1, %v573_v9 }
 0x2a8   : > { %911 = shalt.err (!%p908_p3)
}
 0x2a9   : > { %s912_s21 = scalar_lea.hbm %s1175_s15, 256  ;;  %s916_s29 = scalar_lea.hbm %s1225_s7, 1024 }
 0x2aa   : > { %p913_p4 = scmp.ne.s32.totalorder %s1175_s15, %s912_s21  ;;  %p917_p9 = scmp.lt.u32.totalorder %s1175_s15, %s1225_s7 }
 0x2ab   : > { %p918_p10 = scmp.lt.u32.totalorder %s916_s29, %s912_s21  ;;  %p920_p12 = scmp.lt.u32.totalorder %s912_s21, %s1175_s15 }
 0x2ac   : > { %p914_p7 = pnand %p913_p4, %p1043_p5 }
 0x2ad   : > { %p919_p11 = por %p918_p10, %p917_p9 }
 0x2ae   : > { %p915_p8 = pneg %p914_p7 }
 0x2af   : > { %p921_p13 = por %p920_p12, %p919_p11 }
 0x2b1   : > { %p922_p0 = pnand %p921_p13, %p915_p8 }
 0x2b3   : > { %925 = shalt.err (!%p922_p0)
}
 0x2b4   : > { %s963_s13 = smov 128   ;;  %s964_s14 = smov 8  }
 0x2b5   : > { %857 = dma.vmem_to_hbm [thread:$0]  (%p1043_p5), %s1170_s8, 256, %s1175_s15, %s1177_s16, %s963_s13, %s963_s13, %s964_s14  }
 0x2b6 PF: > { %p863_p1 = scmp.ge.s32.totalorder %s960_s27, 2  ;;  %s607_s28 = sand.u32 1, %s948_s24  }
 0x2b7   : > { %s608_s18 = scalar_lea.sflag [#allocation3], %s607_s28 }
 0x2b8   : > { %p860_p2 = pnand %p863_p1, %p1047_p6 }
 0x2ba   : > { %943 = dma.done.wait (!%p860_p2), %s608_s18, 256  }
 0x2bb   : > { %945 = vsyncadd (!%p860_p2), %s608_s18, 4294967040  ;;  %p17_p3 = scmp.ge.s32.totalorder %s1030_s30, 6   ;;  %s1228_s24 = smov %s952_s25 }
 0x2bc   : > { %s1229_s25 = smov %s956_s26  ;;  %s1230_s26 = smov %s1041_s10 }
 0x2bd   : > { %s1231_s27 = smov %s1030_s30  ;;  %19 = sbr.rel (!%p17_p3) target bundleno = 3 (0x3), region = 83 }
 0x2c4   :  { %613 = vsyncpa [#allocation3], 1 }
 0x2c5   :  { %615 = vsyncpa [#allocation3 + $0x1], 1 }

</bundles_post_ra>
